<compile_context>
chip_gen: v5e
topology: v5e:2x2
jax: 0.10.0
libtpu: 0.0.40
codegen_flags: <defaults>
</compile_context>

<pallas_src>
import functools

import jax
import jax.numpy as jnp
from jax.experimental import pallas as pl
from jax.experimental.pallas import tpu as pltpu


# Above this many positions the f32 "cos(x) == sin(x + pi/2)" trick loses more
# than ~1e-5 (error ~ pos * 2^-24), so switch to exact cos on the odd lanes.
_PHASE_TRICK_MAX_POS = 128


def _pe_kernel(params_ref, out_ref, *, tile_rows, pos_per_row, exact_cos):
    """Compute one (tile_rows, W) block of the (lane-packed) PE table.

    params_ref is (3, W): [inv_freq; lane_bias; odd_mask]
      pos[r]      = (block_row0 + r) * pos_per_row              (column)
      angle[r, l] = pos[r] * inv_freq[l] + lane_bias[l]
      fast path : out = sin(angle)     (lane_bias carries +pi/2 on cos lanes)
      exact path: out = where(odd, cos(angle), sin(angle))
    """
    i = pl.program_id(0)
    r, _ = out_ref.shape
    p = params_ref[...]
    inv_freq = p[0:1, :]
    lane_bias = p[1:2, :]

    # (r, 1) row index -> position; no full-width iota is materialized.
    row = jax.lax.broadcasted_iota(jnp.int32, (r, 1), 0)
    pos = ((i * tile_rows + row) * pos_per_row).astype(jnp.float32)

    angle = pos * inv_freq + lane_bias          # (r,1) x (1,W) broadcast
    if exact_cos:
        odd = p[2:3, :] > jnp.float32(0.5)
        out = jnp.where(odd, jnp.cos(angle), jnp.sin(angle))
    else:
        out = jnp.sin(angle)
    out_ref[...] = out.astype(out_ref.dtype)


def _choose_tile_rows(rows, width, itemsize, sublane):
    """~4 MiB output tiles, rows a multiple of `sublane`, and >=2 grid steps
    whenever possible so v7x's two TensorCores both get work."""
    if rows <= sublane:
        return rows
    max_rows = (rows // sublane) * sublane
    target = max(sublane,
                 (((4 << 20) // (width * itemsize)) // sublane) * sublane)
    tile = min(target, max_rows)
    if tile >= rows and rows >= 2 * sublane:
        # Whole table would be a single block: split it so the parallel grid
        # axis has at least 2 steps (v7x megacore).
        tile = max(sublane, ((rows // 2) // sublane) * sublane)
    return tile


def _build_pe_table(seq_len, d_model, out_dtype=jnp.float32):
    """(seq_len, d_model) sinusoidal PE table via a Pallas kernel."""
    assert d_model % 2 == 0, "even d_model required"
    assert seq_len < (1 << 24), "positions must be exactly representable in f32"

    exact_cos = seq_len > _PHASE_TRICK_MAX_POS

    col = jnp.arange(d_model, dtype=jnp.int32)
    two_i = (2 * (col // 2)).astype(jnp.float32)
    inv_freq = 1.0 / jnp.power(jnp.float32(10000.0),
                               two_i / jnp.float32(d_model))
    odd = (col % 2) == 1
    odd_mask = odd.astype(jnp.float32)
    if exact_cos:
        phase = jnp.zeros((d_model,), jnp.float32)
    else:
        phase = jnp.where(odd, jnp.float32(jnp.pi / 2.0), jnp.float32(0.0))

    lane_dense = (d_model < 128) and (128 % d_model == 0)
    if lane_dense:
        # Pack 128 // d_model consecutive positions into each 128-lane row so
        # all vector ops / stores are full-lane; unpack row-major afterwards.
        ppr = 128 // d_model
        width = 128
        rows = pl.cdiv(seq_len, ppr)
        lane_pos = (jnp.arange(128, dtype=jnp.int32) // d_model).astype(
            jnp.float32)
        inv_freq_w = jnp.tile(inv_freq, ppr)
        lane_bias_w = lane_pos * inv_freq_w + jnp.tile(phase, ppr)
        odd_w = jnp.tile(odd_mask, ppr)
    else:
        ppr = 1
        width = d_model
        rows = seq_len
        inv_freq_w = inv_freq
        lane_bias_w = phase
        odd_w = odd_mask

    params = jnp.stack([inv_freq_w, lane_bias_w, odd_w], axis=0)  # (3, W)

    itemsize = jnp.dtype(out_dtype).itemsize
    sublane = 8 * (4 // itemsize)          # 8 for f32, 16 for bf16 packing
    tile_rows = _choose_tile_rows(rows, width, itemsize, sublane)
    grid = (pl.cdiv(rows, tile_rows),)
    n_elems = rows * width

    kernel = functools.partial(_pe_kernel, tile_rows=tile_rows,
                               pos_per_row=ppr, exact_cos=exact_cos)
    out = pl.pallas_call(
        kernel,
        out_shape=jax.ShapeDtypeStruct((rows, width), out_dtype),
        grid=grid,
        in_specs=[pl.BlockSpec((3, width), lambda i: (0, 0))],
        out_specs=pl.BlockSpec((tile_rows, width), lambda i: (i, 0)),
        compiler_params=pltpu.CompilerParams(
            dimension_semantics=("parallel",),   # rows independent: 2 TCs split
        ),
        cost_estimate=pl.CostEstimate(
            flops=3 * n_elems,
            transcendentals=(2 if exact_cos else 1) * n_elems,
            bytes_accessed=itemsize * n_elems + 3 * 4 * width,
        ),
    )(params)

    if lane_dense:
        # TODO(synk): consume the packed (rows, 128) slab directly or fuse the
        # "embedding + PE" add into the consumer kernel; this reshape+slice is
        # an HBM relayout for narrow d_model and costs ~1 extra table read+write.
        out = out.reshape(rows * ppr, d_model)[:seq_len]
    return out


def position_encoding_forward(x, d_model, max_len):
    """Equivalent of PositionEncoding(d_model, max_len, dev)(x)."""
    assert max_len == d_model, (
        "reference PyTorch code is only shape-consistent when max_len == "
        "d_model (it uses arange(0, max_len, 2) as the frequency index)"
    )
    assert d_model % 2 == 0, "reference code requires an even d_model"
    _, seq_len = x.shape
    assert 1 <= seq_len <= max_len
    return _build_pe_table(seq_len, d_model)


def _reference(seq_len, d_model, max_len):
    # Pure-JAX reference mirroring the PyTorch __init__ table construction.
    pos = jnp.arange(max_len, dtype=jnp.float32)[:, None]
    _2i = jnp.arange(0, max_len, 2, dtype=jnp.float32)
    ang = pos / jnp.power(10000.0, _2i / d_model)
    enc = jnp.zeros((max_len, d_model), jnp.float32)
    enc = enc.at[:, 0::2].set(jnp.sin(ang))
    enc = enc.at[:, 1::2].set(jnp.cos(ang))
    return enc[:seq_len, :]


if __name__ == "__main__":
    key = jax.random.PRNGKey(0)

    # Small demo consistent with the module (lane-dense path: d_model < 128).
    d_model, max_len = 32, 32
    batch, seq_len = 2, 8
    x = jax.random.randint(key, (batch, seq_len), 0, 100, dtype=jnp.int32)
    out = jax.block_until_ready(position_encoding_forward(x, d_model, max_len))
    ref = _reference(seq_len, d_model, max_len)
    assert out.shape == (seq_len, d_model), out.shape
    assert out.dtype == jnp.float32
    assert jnp.allclose(out, ref, atol=1e-5, rtol=1e-5), (
        float(jnp.max(jnp.abs(out - ref))))

    # Standard-width path (d_model >= 128), fast single-sin phase trick.
    d_model2, max_len2 = 128, 128
    batch2, seq_len2 = 2, 32
    x2 = jax.random.randint(key, (batch2, seq_len2), 0, 100, dtype=jnp.int32)
    out2 = jax.block_until_ready(position_encoding_forward(x2, d_model2, max_len2))
    ref2 = _reference(seq_len2, d_model2, max_len2)
    assert out2.shape == (seq_len2, d_model2), out2.shape
    assert jnp.allclose(out2, ref2, atol=1e-5, rtol=1e-5), (
        float(jnp.max(jnp.abs(out2 - ref2))))

    # Larger table: exercises the exact-cos path and the multi-step grid.
    # (Looser tolerance: at angles ~500 any ulp-level difference in the f32
    # angle computation shifts the output by ~1e-4; both the kernel and the
    # reference carry that intrinsic f32 rounding.)
    d_model3, max_len3 = 512, 512
    batch3, seq_len3 = 2, 512
    x3 = jax.random.randint(key, (batch3, seq_len3), 0, 100, dtype=jnp.int32)
    out3 = jax.block_until_ready(position_encoding_forward(x3, d_model3, max_len3))
    ref3 = _reference(seq_len3, d_model3, max_len3)
    assert out3.shape == (seq_len3, d_model3), out3.shape
    assert jnp.allclose(out3, ref3, atol=1e-3, rtol=1e-3), (
        float(jnp.max(jnp.abs(out3 - ref3))))

    print("KERNEL_OK")
</pallas_src>

<mosaic_0001>
module attributes {stable_mosaic.version = 11 : i64} {
  func.func @_pe_kernel(%arg0: i32, %arg1: memref<3x128xf32, #tpu.memory_space<vmem>>, %arg2: memref<2x128xf32, #tpu.memory_space<vmem>>) attributes {dimension_semantics = [#tpu.dimension_semantics<parallel>], iteration_bounds = array<i64: 1>, scalar_prefetch = 0 : i64, scratch_operands = 0 : i64, tpu.core_type = #tpu.core_type<tc>, window_params = [{pipeline_mode = #tpu.pipeline_mode<synchronous>, transform_indices = @transform_0, window_bounds = array<i64: 3, 128>}, {transform_indices = @transform_1, window_bounds = array<i64: 2, 128>}]} {
    %c0 = arith.constant 0 : index
    %c0_0 = arith.constant 0 : index
    %0 = vector.load %arg1[%c0, %c0_0] : memref<3x128xf32, #tpu.memory_space<vmem>>, vector<3x128xf32>
    %1 = vector.extract_strided_slice %0 {offsets = [0, 0], sizes = [1, 128], strides = [1, 1]} : vector<3x128xf32> to vector<1x128xf32>
    %2 = vector.extract_strided_slice %0 {offsets = [1, 0], sizes = [1, 128], strides = [1, 1]} : vector<3x128xf32> to vector<1x128xf32>
    %3 = tpu.iota {dimensions = array<i32: 0>} : vector<2x1xi32>
    %c2_i32 = arith.constant 2 : i32
    %4 = arith.muli %arg0, %c2_i32 : i32
    %5 = vector.broadcast %4 : i32 to vector<2x1xi32>
    %6 = arith.addi %5, %3 : vector<2x1xi32>
    %c4_i32 = arith.constant 4 : i32
    %7 = vector.broadcast %c4_i32 : i32 to vector<2x1xi32>
    %8 = arith.muli %6, %7 : vector<2x1xi32>
    %9 = arith.sitofp %8 : vector<2x1xi32> to vector<2x1xf32>
    %10 = vector.broadcast %9 : vector<2x1xf32> to vector<2x128xf32>
    %11 = vector.broadcast %1 : vector<1x128xf32> to vector<2x128xf32>
    %12 = arith.mulf %10, %11 : vector<2x128xf32>
    %13 = vector.broadcast %2 : vector<1x128xf32> to vector<2x128xf32>
    %14 = arith.addf %12, %13 : vector<2x128xf32>
    %15 = math.sin %14 : vector<2x128xf32>
    %c0_1 = arith.constant 0 : index
    %c0_2 = arith.constant 0 : index
    %16 = vector.load %arg2[%c0_1, %c0_2] : memref<2x128xf32, #tpu.memory_space<vmem>>, vector<2x128xf32>
    tpu.vector_store %arg2[%c0_1, %c0_2], %15 {strides = array<i32>} : memref<2x128xf32, #tpu.memory_space<vmem>>, vector<2x128xf32>,
    return
  }
  func.func @transform_0(%arg0: i32) -> (i32, i32) {
    %c0_i32 = arith.constant 0 : i32
    %c0_i32_0 = arith.constant 0 : i32
    %c0_i32_1 = arith.constant 0 : i32
    return %c0_i32, %c0_i32_0 : i32, i32
  }
  func.func @transform_1(%arg0: i32) -> (i32, i32) {
    %c0_i32 = arith.constant 0 : i32
    %c0_i32_0 = arith.constant 0 : i32
    return %arg0, %c0_i32 : i32, i32
  }
}

</mosaic_0001>

<bundles_post_ra>
// kernel: tpu_custom_call.1
= control target key start
LH: loop header
LB: loop body
LE: loop exit
PB: predicated region body
PF: predicated region fallthrough
CT: control target
= control target key end

     0   :  { %6 = vsyncpa [#allocation3], 0  ;;  %s343_s0 = inlined_call_operand.hbm [shape: f32[3,128], index: 0, kind: input, shape index: {}]   ;;  %s344_s1 = inlined_call_operand.hbm [shape: f32[2,128], index: 1, kind: output, shape index: {}]  }
   0x1   :  { %7 = vsyncpa [#allocation4], 0  ;;  %s13_s8 = sshll.u32 %s343_s0, 4  ;;  %s272_s9 = smov [#allocation2]   ;;  %s14_s8 = int_to_ptr.hbm [resolvable:$true] %s13_s8 }
   0x2   :  { %s15_s10 = sshll.u32 %s272_s9, 4  ;;  %s16_s10 = int_to_ptr.vmem [resolvable:$true] %s15_s10 }
   0x3   :  { %18 = dma.hbm_to_vmem [thread:$0]  %s14_s8, 64, %s16_s10, [#allocation3]  }
   0x4   :  { %268 = dma.done.wait [#allocation3], 64  }
   0x5   :  { %269 = vsyncadd [#allocation3], 4294967232  ;;  %v24_v0 = vlaneseq  ;;  %v23_v4 = vld [vmem:[#allocation2] sm:$0x7]  ;;  %v273_v20 = vmov 683565275  }
   0x6   :  { %v31_v5 = vperm.slane %v23_v4, 0  ;;  %v33_v6 = vperm.slane %v23_v4, 1  ;;  %v274_v22 = vmov 2475754826   ;;  %v275_v24 = vmov 2131351028  }
   0x7   :  { %v25_v1 = vshrl.u32 %v24_v0, 7  ;;  %v276_v26 = vmov 2102212464   ;;  %v277_v28 = vmov 920167782   ;;  %s280_s0 = smov [#allocation5]  }
   0x8   :  { %v278_v34 = vmov 1326507024   ;;  %s196_s11 = sshll.u32 %s280_s0, 4  ;;  %s198_s14 = sshll.u32 %s344_s1, 4  ;;  %s197_s11 = int_to_ptr.vmem [resolvable:$true] %s196_s11  ;;  %s199_s14 = int_to_ptr.hbm [resolvable:$true] %s198_s14 }
   0x9   :  { %v29_v2 = vmul.u32 4, %v25_v1 }
   0xb   :  { %v30_v3 = vcvt.s32.f32 %v29_v2 }
   0xd   :  { %v32_v7 = vmul.f32 %v31_v5, %v30_v3 }
   0xf   :  { %v294_v8 = vadd.f32 %v33_v6, %v32_v7 }
  0x11   :  { %v38_v9 = vand.u32 2139095040, %v294_v8  ;;  %v35_v11 = vand.u32 2147483647, %v294_v8  ;;  %vm37_vm12 = vcmp.lt.s32.totalorder %v294_v8, 0 }
  0x13   :  { %v39_v10 = vshrl.u32 %v38_v9, 23  ;;  %v42_v14 = vand.u32 8388607, %v35_v11  ;;  %v279_v9 = vmov 0   ;;  %vm36_vm13 = vcmp.le.f32.partialorder %v35_v11, 0.7853982 }
  0x15   :  { %v208_v12 = vadd.s32 4294967169, %v39_v10  ;;  %v43_v17 = vor.u32 8388608, %v42_v14 }
  0x17   :  { %v45_v13 = vadd.s32 1, %v208_v12  ;;  %v303_v36 = vshll.u32 %v43_v17, 8 }
  0x19   :  { %vm46_vm0 = vcmp.gt.s32.totalorder %v45_v13, 0  ;;  %v84_v48 = vand.u32 65535, %v303_v36  ;;  %v85_v49 = vshrl.u32 %v303_v36, 16 }
  0x1a   :  { %v47_v15 = vsel %vm46_vm0, %v45_v13, 0 }
  0x1b   :  { %v49_v16 = vand.u32 31, %v47_v15  ;;  %v300_v18 = vshrl.u32 %v47_v15, 5 }
  0x1d   :  { %v50_v19 = vsub.s32 32, %v49_v16  ;;  %v52_v21 = vshll.u32 %v273_v20, %v49_v16  ;;  %v55_v23 = vshll.u32 %v274_v22, %v49_v16  ;;  %v58_v25 = vshll.u32 %v275_v24, %v49_v16 }
  0x1e   :  { %v61_v27 = vshll.u32 %v276_v26, %v49_v16  ;;  %v64_v29 = vshll.u32 %v277_v28, %v49_v16  ;;  %vm67_vm1 = vcmp.lt.s32.totalorder %v300_v18, 1  ;;  %vm70_vm2 = vcmp.lt.s32.totalorder %v300_v18, 4 }
  0x1f   :  { %v53_v30 = vshrl.u32 %v274_v22, %v50_v19  ;;  %v56_v31 = vshrl.u32 %v275_v24, %v50_v19  ;;  %v59_v32 = vshrl.u32 %v276_v26, %v50_v19  ;;  %v62_v33 = vshrl.u32 %v277_v28, %v50_v19 }
  0x20   :  { %v65_v35 = vshrl.u32 %v278_v34, %v50_v19  ;;  %vm69_vm3 = vcmp.lt.s32.totalorder %v300_v18, 3  ;;  %vm68_vm4 = vcmp.lt.s32.totalorder %v300_v18, 2  ;;  %v51_v56 = vshrl.u32 %v273_v20, %v50_v19 }
  0x21   :  { %v54_v37 = vor.u32 %v53_v30, %v52_v21  ;;  %v57_v38 = vor.u32 %v56_v31, %v55_v23  ;;  %v60_v39 = vor.u32 %v59_v32, %v58_v25  ;;  %v63_v40 = vor.u32 %v62_v33, %v61_v27 }
  0x22   :  { %v66_v41 = vor.u32 %v65_v35, %v64_v29 }
  0x23   :  { %v75_v42 = vsel %vm67_vm1, %v54_v37, %v57_v38  ;;  %v79_v43 = vsel %vm67_vm1, %v57_v38, %v60_v39  ;;  %v76_v44 = vsel %vm70_vm2, %v63_v40, 920167782  ;;  %v71_v5 = vsel %vm67_vm1, %v51_v56, %v54_v37 }
  0x24   :  { %v80_v45 = vsel %vm70_vm2, %v66_v41, 1326507024  ;;  %v77_v46 = vsel %vm69_vm3, %v60_v39, %v76_v44  ;;  %v72_v7 = vsel %vm70_vm2, %v60_v39, 2102212464  ;;  %vm178_vm1 = vweird.f32 %v294_v8 }
  0x25   :  { %v81_v47 = vsel %vm69_vm3, %v63_v40, %v80_v45  ;;  %v78_v50 = vsel %vm68_vm4, %v75_v42, %v77_v46  ;;  %v73_v20 = vsel %vm69_vm3, %v57_v38, %v72_v7 }
  0x26   :  { %v82_v51 = vsel %vm68_vm4, %v79_v43, %v81_v47  ;;  %v108_v54 = vand.u32 65535, %v78_v50  ;;  %v109_v55 = vshrl.u32 %v78_v50, 16  ;;  %v74_v28 = vsel %vm68_vm4, %v71_v5, %v73_v20 }
  0x27   :  { %v86_v52 = vand.u32 65535, %v82_v51  ;;  %v87_v53 = vshrl.u32 %v82_v51, 16  ;;  %v128_v32 = vmul.u32 %v303_v36, %v74_v28 }
  0x28   :  { %v110_v60 = vmul.u32 %v108_v54, %v84_v48  ;;  %v111_v61 = vmul.u32 %v109_v55, %v84_v48  ;;  %v112_v62 = vmul.u32 %v108_v54, %v85_v49  ;;  %v113_v2 = vmul.u32 %v109_v55, %v85_v49 }
  0x29   :  { %v88_v57 = vmul.u32 %v86_v52, %v84_v48  ;;  %v89_v58 = vmul.u32 %v87_v53, %v84_v48  ;;  %v90_v59 = vmul.u32 %v86_v52, %v85_v49  ;;  %v91_v63 = vmul.u32 %v87_v53, %v85_v49 }
  0x2a   :  { %v114_v3 = vshll.u32 %v111_v61, 16  ;;  %v116_v4 = vshll.u32 %v112_v62, 16  ;;  %v115_v17 = vshrl.u32 %v111_v61, 16  ;;  %v117_v24 = vshrl.u32 %v112_v62, 16 }
  0x2b   :  { %v92_v0 = vshll.u32 %v89_v58, 16  ;;  %v94_v1 = vshll.u32 %v90_v59, 16  ;;  %v93_v13 = vshrl.u32 %v89_v58, 16  ;;  %v95_v21 = vshrl.u32 %v90_v59, 16 }
  0x2c   :  { %vm118_vm6 = vc.u32 %v110_v60, %v114_v3  ;;  %v120_v12 = vadd.s32 %v114_v3, %v110_v60 }
  0x2d   :  { %vm96_vm5 = vc.u32 %v88_v57, %v92_v0  ;;  %v98_v6 = vadd.s32 %v92_v0, %v88_v57  ;;  %v119_v15 = vsel %vm118_vm6, 1, %v279_v9 }
  0x2e   :  { %v97_v10 = vsel %vm96_vm5, 1, %v279_v9  ;;  %v121_v19 = vadd.s32 %v119_v15, %v113_v2  ;;  %vm122_vm8 = vc.u32 %v120_v12, %v116_v4  ;;  %v124_v27 = vadd.s32 %v120_v12, %v116_v4 }
  0x2f   :  { %v99_v14 = vadd.s32 %v97_v10, %v91_v63  ;;  %vm100_vm7 = vc.u32 %v98_v6, %v94_v1  ;;  %v123_v23 = vsel %vm122_vm8, 1, %v279_v9 }
  0x30   :  { %v101_v16 = vsel %vm100_vm7, 1, %v279_v9  ;;  %v125_v25 = vadd.s32 %v123_v23, %v121_v19 }
  0x31   :  { %v103_v22 = vadd.s32 %v101_v16, %v99_v14 }
  0x32   :  { %v126_v29 = vadd.s32 %v125_v25, %v115_v17 }
  0x33   :  { %v104_v26 = vadd.s32 %v103_v22, %v93_v13 }
  0x34   :  { %v127_v31 = vadd.s32 %v126_v29, %v117_v24 }
  0x35   :  { %v105_v30 = vadd.s32 %v104_v26, %v95_v21 }
  0x36   :  { %v131_v33 = vadd.s32 1, %v127_v31 }
  0x37   :  { %vm130_vm9 = vc.u32 %v105_v30, %v124_v27  ;;  %v129_v18 = vadd.s32 %v124_v27, %v105_v30 }
  0x38   :  { %v132_v34 = vsel %vm130_vm9, %v131_v33, %v127_v31 }
  0x39   :  { %v133_v35 = vadd.s32 %v132_v34, %v128_v32 }
  0x3b   :  { %v134_v37 = vadd.s32 536870912, %v133_v35 }
  0x3d   :  { %v135_v38 = vshrl.u32 %v134_v37, 30 }
  0x3f   :  { %v136_v39 = vshll.u32 %v135_v38, 30  ;;  %v159_v56 = vsub.s32 4, %v135_v38 }
  0x41   :  { %v137_v40 = vsub.s32 %v133_v35, %v136_v39  ;;  %v160_v59 = vsel %vm37_vm12, %v159_v56, %v135_v38 }
  0x42   :  { %v162_v62 = vsel %vm36_vm13, 0, %v160_v59 }
  0x43   :  { %vm138_vm10 = vcmp.lt.s32.totalorder %v137_v40, 0  ;;  %v139_v41 = vsub.s32 0, %v137_v40  ;;  %v179_v3 = vadd.s32 3, %v162_v62 }
  0x45   :  { %v140_v42 = vsel %vm138_vm10, %v139_v41, %v137_v40  ;;  %v180_v9 = vand.u32 3, %v179_v3 }
  0x46   :  { %v141_v43 = vclz %v140_v42 }
  0x47   :  { %vm185_vm14 = vcmp.eq.s32.totalorder %v180_v9, 2  ;;  %vm182_vm15 = vcmp.eq.s32.totalorder %v180_v9, 0  ;;  %vm181_vm0 = vcmp.lt.s32.totalorder %v180_v9, 2 }
  0x48   :  { %v209_v44 = vadd.s32 4294967294, %v141_v43 }
  0x4a   :  { %vm210_vm11 = vcmp.lt.s32.totalorder %v209_v44, 0 }
  0x4b   :  { %v144_v45 = vsel %vm210_vm11, 0, %v209_v44 }
  0x4c   :  { %v145_v46 = vsub.s32 32, %v144_v45  ;;  %v146_v47 = vshll.u32 %v137_v40, %v144_v45  ;;  %v149_v48 = vsub.s32 4294967266, %v144_v45 }
  0x4e   :  { %v147_v36 = vshrl.u32 %v129_v18, %v145_v46  ;;  %v150_v49 = vadd.s32 127, %v149_v48 }
  0x50   :  { %v148_v50 = vor.u32 %v147_v36, %v146_v47  ;;  %v151_v51 = vshll.u32 %v150_v49, 23 }
  0x52   :  { %v152_v52 = vor.u32 4788187, %v151_v51  ;;  %v155_v53 = vcvt.s32.f32 %v148_v50 }
  0x54   :  { %v153_v54 = vand.u32 2147483647, %v152_v52 }
  0x56   :  { %v156_v55 = vmul.f32 %v155_v53, %v153_v54 }
  0x58   :  { %v157_v57 = vxor.u32 2147483648, %v156_v55 }
  0x5a   :  { %v158_v58 = vsel %vm37_vm12, %v157_v57, %v156_v55 }
  0x5b   :  { %v161_v60 = vsel %vm36_vm13, %v294_v8, %v158_v58 }
  0x5c   :  { %v163_v61 = vmul.f32 %v161_v60, %v161_v60 }
  0x5e   :  { %v164_v63 = vmul.f32 -0.001358992, %v163_v61  ;;  %v171_v0 = vmul.f32 -0.00019511016, %v163_v61 }
  0x60   :  { %v165_v1 = vadd.f32 0.041655596, %v164_v63  ;;  %v172_v2 = vadd.f32 0.008332121, %v171_v0 }
  0x62   :  { %v166_v4 = vmul.f32 %v165_v1, %v163_v61  ;;  %v173_v5 = vmul.f32 %v172_v2, %v163_v61 }
  0x64   :  { %v167_v6 = vadd.f32 -0.4999988, %v166_v4  ;;  %v174_v7 = vadd.f32 -0.16666654, %v173_v5 }
  0x66   :  { %v168_v10 = vmul.f32 %v167_v6, %v163_v61  ;;  %v175_v12 = vmul.f32 %v174_v7, %v163_v61 }
  0x68   :  { %v169_v11 = vadd.f32 1.0, %v168_v10  ;;  %v176_v13 = vadd.f32 1.0, %v175_v12 }
  0x6a   :  { %v177_v14 = vmul.f32 %v176_v13, %v161_v60  ;;  %v186_v15 = vxor.u32 2147483648, %v169_v11 }
  0x6c   :  { %v183_v16 = vxor.u32 2147483648, %v177_v14  ;;  %v187_v17 = vsel %vm185_vm14, %v186_v15, %v177_v14 }
  0x6e   :  { %v184_v19 = vsel %vm182_vm15, %v169_v11, %v183_v16 }
  0x6f   :  { %v188_v20 = vsel %vm181_vm0, %v184_v19, %v187_v17 }
  0x70   :  { %v189_v21 = vsel %vm178_vm1, nan, %v188_v20 }
  0x71   :  { %190 = vst [vmem:[#allocation5] sm:$0x3] %v189_v21 }
  0x72   :  { %201 = dma.vmem_to_hbm [thread:$0]  %s197_s11, 32, %s199_s14, [#allocation4]  }
  0x73   :  { %270 = dma.done.wait [#allocation4], 32  }
  0x74   :  { %271 = vsyncadd [#allocation4], 4294967264 }
  0x75   :  { %206 = vsyncpa [#allocation3], 1 }
  0x76   :  { %207 = vsyncpa [#allocation4], 1 }

</bundles_post_ra>
